<compile_context>
chip_gen: v7x
topology: tpu7x:2x2x1
jax: 0.10.0
libtpu: 0.0.40
codegen_flags: <defaults>
</compile_context>

<pallas_src>
import functools

import jax
import jax.numpy as jnp
from jax.experimental import pallas as pl
from jax.experimental.pallas import tpu as pltpu

_LANE = 128
_SUBLANE = 8
_MIB = 1024 * 1024


def _round_up(n, m):
    return ((n + m - 1) // m) * m


def _cdiv(a, b):
    return -(-a // b)


def _silu(x):
    # TODO(synk): in the tiny-K/H (EUP-bound) regime on v6e/v7x, switch to an
    # exp + pl.reciprocal(approx=True) form to halve EUP pressure.
    return x * jax.nn.sigmoid(x)


# ---------------------------------------------------------------------------
# Kernel: whole 3-layer MLP for one batch tile; padded weights resident in VMEM
# ---------------------------------------------------------------------------
def regression_head_kernel(x_ref, w1_ref, b1_ref, w2_ref, b2_ref, w3_ref, b3_ref,
                           o_ref):
    # Cast activations to the weight dtype so every layer uses the native
    # (e.g. bf16) MXU path; accumulation stays f32 via preferred_element_type.
    x = x_ref[...].astype(w1_ref.dtype)

    # Layer 1: Linear + SiLU (bias add on the f32 accumulator).
    h = jnp.dot(x, w1_ref[...], preferred_element_type=jnp.float32) + b1_ref[...]
    h = _silu(h)

    # Layer 2: Linear + SiLU.
    h = h.astype(w2_ref.dtype)
    h = jnp.dot(h, w2_ref[...], preferred_element_type=jnp.float32) + b2_ref[...]
    h = _silu(h)

    # Layer 3: Linear (output columns padded to 128 -> lane-dense store).
    h = h.astype(w3_ref.dtype)
    o = jnp.dot(h, w3_ref[...], preferred_element_type=jnp.float32) + b3_ref[...]
    o_ref[...] = o.astype(o_ref.dtype)


# ---------------------------------------------------------------------------
# Host-side helpers
# ---------------------------------------------------------------------------
def _invariant_spec(shape):
    """BlockSpec for a grid-invariant (never re-DMA'd) operand, single-buffered."""
    index_map = lambda i: (0, 0)
    try:
        return pl.BlockSpec(shape, index_map, pipeline_mode=pl.Buffered(1))
    except Exception:  # older jax without pipeline_mode / Buffered
        return pl.BlockSpec(shape, index_map)


def _vmem_limit_bytes():
    try:
        phys = int(pltpu.get_tpu_info().vmem_capacity_bytes)
    except Exception:
        phys = 64 * _MIB  # conservative (v7x) if the query is unavailable
    # ~54 MiB on v7x (64 MiB physical), capped at ~110 MiB on v5e/v6e (128 MiB).
    return min(int(phys * 0.85), 110 * _MIB)


def _select_batch_tile(B, K, H, N, x_itemsize, w_itemsize, block_b, vmem_limit):
    """Pick (bb, B_pad) minimizing padding waste subject to a VMEM budget."""
    # Single-buffered weights + f32 biases resident for the whole grid.
    weight_bytes = (K * H + H * H + H * N) * w_itemsize + (2 * H + N) * 4
    budget = int(vmem_limit * 0.85)

    B8 = _round_up(max(int(B), 1), _SUBLANE)
    # >= 2 grid steps whenever possible: lets "parallel" shard across v7x's two
    # TensorCores and overlaps the x DMA of step i+1 with compute of step i.
    min_steps = 2 if B8 >= 2 * _SUBLANE else 1
    nsteps = max(min_steps, _cdiv(B8, block_b))
    while True:
        bb = _round_up(_cdiv(B8, nsteps), _SUBLANE)
        per_tile = (2 * bb * K * x_itemsize      # x tile, double-buffered
                    + 2 * bb * N * x_itemsize    # out tile, double-buffered
                    + 2 * bb * H * 4)            # two live (bb, H) f32 intermediates
        if weight_bytes + per_tile <= budget or bb <= _SUBLANE:
            break
        nsteps += 1
    # TODO(synk): if weight_bytes alone exceeds the budget (bf16 H >= ~4096 on
    # v7x), switch to an H-tiled layer-2 contraction with a VMEM accumulator
    # and pl.when init/finalize instead of keeping all weights resident.
    B_pad = _round_up(B8, bb)
    return bb, B_pad


def pad_params(w1, b1, w2, b2, w3, b3):
    """Pad weights/biases to lane-aligned shapes ONCE (keep out of the hot path)."""
    input_dim, hidden_dim = w1.shape
    output_dim = w3.shape[1]
    K = _round_up(input_dim, _LANE)
    H = _round_up(hidden_dim, _LANE)
    N = _round_up(output_dim, _LANE)
    wdt = w1.dtype
    w1_p = jnp.zeros((K, H), wdt).at[:input_dim, :hidden_dim].set(w1)
    w2_p = jnp.zeros((H, H), wdt).at[:hidden_dim, :hidden_dim].set(w2)
    w3_p = jnp.zeros((H, N), wdt).at[:hidden_dim, :output_dim].set(w3)
    b1_p = jnp.zeros((1, H), jnp.float32).at[0, :hidden_dim].set(b1.astype(jnp.float32))
    b2_p = jnp.zeros((1, H), jnp.float32).at[0, :hidden_dim].set(b2.astype(jnp.float32))
    b3_p = jnp.zeros((1, N), jnp.float32).at[0, :output_dim].set(b3.astype(jnp.float32))
    dims = dict(input_dim=input_dim, hidden_dim=hidden_dim, output_dim=output_dim)
    return (w1_p, b1_p, w2_p, b2_p, w3_p, b3_p), dims


@functools.partial(
    jax.jit,
    static_argnames=("input_dim", "hidden_dim", "output_dim", "block_b"))
def regression_head_padded(x, w1_p, b1_p, w2_p, b2_p, w3_p, b3_p, *,
                           input_dim, hidden_dim, output_dim, block_b=512):
    """y = Linear3(SiLU(Linear2(SiLU(Linear1(x))))), with pre-padded params."""
    B = x.shape[0]
    K, H = w1_p.shape
    N = w3_p.shape[1]

    vmem_limit = _vmem_limit_bytes()
    bb, B_pad = _select_batch_tile(B, K, H, N,
                                   jnp.dtype(x.dtype).itemsize,
                                   jnp.dtype(w1_p.dtype).itemsize,
                                   block_b, vmem_limit)
    grid = (B_pad // bb,)

    # Only copy/pad x when required (batch remainder or ragged input_dim);
    # otherwise stream x straight from HBM with no extra traffic.
    if B_pad != B or K != input_dim:
        x_p = jnp.zeros((B_pad, K), x.dtype).at[:B, :input_dim].set(x)
    else:
        x_p = x

    w_itemsize = jnp.dtype(w1_p.dtype).itemsize
    cost = pl.CostEstimate(
        flops=2 * B_pad * (K * H + H * H + H * N),
        transcendentals=2 * B_pad * H,  # two SiLU layers
        bytes_accessed=(B_pad * (K + N) * jnp.dtype(x.dtype).itemsize
                        + (K * H + H * H + H * N) * w_itemsize),
    )

    out = pl.pallas_call(
        regression_head_kernel,
        out_shape=jax.ShapeDtypeStruct((B_pad, N), x.dtype),
        grid_spec=pltpu.PrefetchScalarGridSpec(
            num_scalar_prefetch=0,
            grid=grid,
            in_specs=[
                pl.BlockSpec((bb, K), lambda i: (i, 0)),  # x (batch-tiled)
                _invariant_spec((K, H)),                   # w1 (single-buffered)
                _invariant_spec((1, H)),                   # b1
                _invariant_spec((H, H)),                   # w2
                _invariant_spec((1, H)),                   # b2
                _invariant_spec((H, N)),                   # w3
                _invariant_spec((1, N)),                   # b3
            ],
            out_specs=pl.BlockSpec((bb, N), lambda i: (i, 0)),
        ),
        compiler_params=pltpu.CompilerParams(
            dimension_semantics=("parallel",),
            vmem_limit_bytes=vmem_limit,
        ),
        cost_estimate=cost,
    )(x_p, w1_p, b1_p, w2_p, b2_p, w3_p, b3_p)

    # Strip batch padding and the lane-padding of the output dimension.
    return out[:B, :output_dim]


def regression_head(x, w1, b1, w2, b2, w3, b3, *, block_b=512):
    """Convenience wrapper (pads params per call; prefer pad_params() once)."""
    padded, dims = pad_params(w1, b1, w2, b2, w3, b3)
    return regression_head_padded(x, *padded, **dims, block_b=block_b)


# ---------------------------------------------------------------------------
# Parameter init matching RegressionHead.reset_parameters()
# ---------------------------------------------------------------------------
def xavier_uniform(key, fan_in, fan_out, dtype=jnp.float32):
    bound = jnp.sqrt(6.0 / (fan_in + fan_out))
    return jax.random.uniform(key, (fan_in, fan_out), dtype=dtype,
                              minval=-bound, maxval=bound)


def init_params(key, input_dim, hidden_dim, output_dim, dtype=jnp.float32):
    k1, k2, k3 = jax.random.split(key, 3)
    w1 = xavier_uniform(k1, input_dim, hidden_dim, dtype)
    w2 = xavier_uniform(k2, hidden_dim, hidden_dim, dtype)
    w3 = xavier_uniform(k3, hidden_dim, output_dim, dtype)
    b1 = jnp.zeros((hidden_dim,), dtype)
    b2 = jnp.zeros((hidden_dim,), dtype)
    b3 = jnp.zeros((output_dim,), dtype)
    return w1, b1, w2, b2, w3, b3


def reference(x, w1, b1, w2, b2, w3, b3):
    h = _silu(x @ w1 + b1)
    h = _silu(h @ w2 + b2)
    return h @ w3 + b3


if __name__ == "__main__":
    # Small shapes consistent with the module's forward:
    #   x: [batch_size, input_dim] -> out: [batch_size, output_dim]
    # Deliberately misaligned (batch=10, 96/64/1) to exercise the padding path.
    batch, input_dim, hidden_dim, output_dim = 10, 96, 64, 1

    key = jax.random.PRNGKey(0)
    kx, kp = jax.random.split(key)
    x = jax.random.normal(kx, (batch, input_dim), dtype=jnp.float32)
    params = init_params(kp, input_dim, hidden_dim, output_dim)

    # Pad the weights/biases once, outside the hot path.
    padded, dims = pad_params(*params)

    out = regression_head_padded(x, *padded, **dims)
    out = jax.block_until_ready(out)

    ref = reference(x, *params)
    assert out.shape == (batch, output_dim), out.shape
    assert jnp.allclose(out, ref, atol=1e-5, rtol=1e-5), \
        f"max abs err {jnp.max(jnp.abs(out - ref))}"

    print("KERNEL_OK")
</pallas_src>

<mosaic_0001>
module attributes {stable_mosaic.version = 11 : i64} {
  func.func @regression_head_kernel(%arg0: i32, %arg1: memref<8x128xf32, #tpu.memory_space<vmem>>, %arg2: memref<128x128xf32, #tpu.memory_space<vmem>>, %arg3: memref<1x128xf32, #tpu.memory_space<vmem>>, %arg4: memref<128x128xf32, #tpu.memory_space<vmem>>, %arg5: memref<1x128xf32, #tpu.memory_space<vmem>>, %arg6: memref<128x128xf32, #tpu.memory_space<vmem>>, %arg7: memref<1x128xf32, #tpu.memory_space<vmem>>, %arg8: memref<8x128xf32, #tpu.memory_space<vmem>>) attributes {dimension_semantics = [#tpu.dimension_semantics<parallel>], iteration_bounds = array<i64: 2>, scalar_prefetch = 0 : i64, scratch_operands = 0 : i64, tpu.core_type = #tpu.core_type<tc>, window_params = [{transform_indices = @transform_0, window_bounds = array<i64: 8, 128>}, {pipeline_mode = #tpu.pipeline_mode<synchronous>, transform_indices = @transform_1, window_bounds = array<i64: 128, 128>}, {pipeline_mode = #tpu.pipeline_mode<synchronous>, transform_indices = @transform_2, window_bounds = array<i64: 1, 128>}, {pipeline_mode = #tpu.pipeline_mode<synchronous>, transform_indices = @transform_3, window_bounds = array<i64: 128, 128>}, {pipeline_mode = #tpu.pipeline_mode<synchronous>, transform_indices = @transform_4, window_bounds = array<i64: 1, 128>}, {pipeline_mode = #tpu.pipeline_mode<synchronous>, transform_indices = @transform_5, window_bounds = array<i64: 128, 128>}, {pipeline_mode = #tpu.pipeline_mode<synchronous>, transform_indices = @transform_6, window_bounds = array<i64: 1, 128>}, {transform_indices = @transform_7, window_bounds = array<i64: 8, 128>}]} {
    %c0 = arith.constant 0 : index
    %c0_0 = arith.constant 0 : index
    %0 = vector.load %arg1[%c0, %c0_0] : memref<8x128xf32, #tpu.memory_space<vmem>>, vector<8x128xf32>
    %c0_1 = arith.constant 0 : index
    %c0_2 = arith.constant 0 : index
    %1 = vector.load %arg2[%c0_1, %c0_2] : memref<128x128xf32, #tpu.memory_space<vmem>>, vector<128x128xf32>
    %cst = arith.constant dense<0.000000e+00> : vector<8x128xf32>
    %2 = tpu.matmul %0, %1, %cst {dimension_numbers = #tpu.dot_dimension_numbers<[1], [0], [0], [1], [0, 0, 1, 1], [], []>} : vector<8x128xf32>, vector<128x128xf32>, vector<8x128xf32> -> vector<8x128xf32>
    %c0_3 = arith.constant 0 : index
    %c0_4 = arith.constant 0 : index
    %3 = vector.load %arg3[%c0_3, %c0_4] : memref<1x128xf32, #tpu.memory_space<vmem>>, vector<1x128xf32>
    %4 = vector.broadcast %3 : vector<1x128xf32> to vector<8x128xf32>
    %5 = arith.addf %2, %4 : vector<8x128xf32>
    %6 = arith.negf %5 : vector<8x128xf32>
    %7 = math.exp %6 : vector<8x128xf32>
    %cst_5 = arith.constant 1.000000e+00 : f32
    %8 = vector.broadcast %cst_5 : f32 to vector<8x128xf32>
    %9 = arith.addf %8, %7 : vector<8x128xf32>
    %10 = arith.divf %8, %9 : vector<8x128xf32>
    %11 = arith.mulf %5, %10 : vector<8x128xf32>
    %c0_6 = arith.constant 0 : index
    %c0_7 = arith.constant 0 : index
    %12 = vector.load %arg4[%c0_6, %c0_7] : memref<128x128xf32, #tpu.memory_space<vmem>>, vector<128x128xf32>
    %cst_8 = arith.constant dense<0.000000e+00> : vector<8x128xf32>
    %13 = tpu.matmul %11, %12, %cst_8 {dimension_numbers = #tpu.dot_dimension_numbers<[1], [0], [0], [1], [0, 0, 1, 1], [], []>} : vector<8x128xf32>, vector<128x128xf32>, vector<8x128xf32> -> vector<8x128xf32>
    %c0_9 = arith.constant 0 : index
    %c0_10 = arith.constant 0 : index
    %14 = vector.load %arg5[%c0_9, %c0_10] : memref<1x128xf32, #tpu.memory_space<vmem>>, vector<1x128xf32>
    %15 = vector.broadcast %14 : vector<1x128xf32> to vector<8x128xf32>
    %16 = arith.addf %13, %15 : vector<8x128xf32>
    %17 = arith.negf %16 : vector<8x128xf32>
    %18 = math.exp %17 : vector<8x128xf32>
    %cst_11 = arith.constant 1.000000e+00 : f32
    %19 = vector.broadcast %cst_11 : f32 to vector<8x128xf32>
    %20 = arith.addf %19, %18 : vector<8x128xf32>
    %21 = arith.divf %19, %20 : vector<8x128xf32>
    %22 = arith.mulf %16, %21 : vector<8x128xf32>
    %c0_12 = arith.constant 0 : index
    %c0_13 = arith.constant 0 : index
    %23 = vector.load %arg6[%c0_12, %c0_13] : memref<128x128xf32, #tpu.memory_space<vmem>>, vector<128x128xf32>
    %cst_14 = arith.constant dense<0.000000e+00> : vector<8x128xf32>
    %24 = tpu.matmul %22, %23, %cst_14 {dimension_numbers = #tpu.dot_dimension_numbers<[1], [0], [0], [1], [0, 0, 1, 1], [], []>} : vector<8x128xf32>, vector<128x128xf32>, vector<8x128xf32> -> vector<8x128xf32>
    %c0_15 = arith.constant 0 : index
    %c0_16 = arith.constant 0 : index
    %25 = vector.load %arg7[%c0_15, %c0_16] : memref<1x128xf32, #tpu.memory_space<vmem>>, vector<1x128xf32>
    %26 = vector.broadcast %25 : vector<1x128xf32> to vector<8x128xf32>
    %27 = arith.addf %24, %26 : vector<8x128xf32>
    %c0_17 = arith.constant 0 : index
    %c0_18 = arith.constant 0 : index
    %28 = vector.load %arg8[%c0_17, %c0_18] : memref<8x128xf32, #tpu.memory_space<vmem>>, vector<8x128xf32>
    tpu.vector_store %arg8[%c0_17, %c0_18], %27 {strides = array<i32>} : memref<8x128xf32, #tpu.memory_space<vmem>>, vector<8x128xf32>,
    return
  }
  func.func @transform_0(%arg0: i32) -> (i32, i32) {
    %c0_i32 = arith.constant 0 : i32
    %c0_i32_0 = arith.constant 0 : i32
    return %arg0, %c0_i32 : i32, i32
  }
  func.func @transform_1(%arg0: i32) -> (i32, i32) {
    %c0_i32 = arith.constant 0 : i32
    %c0_i32_0 = arith.constant 0 : i32
    %c0_i32_1 = arith.constant 0 : i32
    return %c0_i32, %c0_i32_0 : i32, i32
  }
  func.func @transform_2(%arg0: i32) -> (i32, i32) {
    %c0_i32 = arith.constant 0 : i32
    %c0_i32_0 = arith.constant 0 : i32
    %c0_i32_1 = arith.constant 0 : i32
    return %c0_i32, %c0_i32_0 : i32, i32
  }
  func.func @transform_3(%arg0: i32) -> (i32, i32) {
    %c0_i32 = arith.constant 0 : i32
    %c0_i32_0 = arith.constant 0 : i32
    %c0_i32_1 = arith.constant 0 : i32
    return %c0_i32, %c0_i32_0 : i32, i32
  }
  func.func @transform_4(%arg0: i32) -> (i32, i32) {
    %c0_i32 = arith.constant 0 : i32
    %c0_i32_0 = arith.constant 0 : i32
    %c0_i32_1 = arith.constant 0 : i32
    return %c0_i32, %c0_i32_0 : i32, i32
  }
  func.func @transform_5(%arg0: i32) -> (i32, i32) {
    %c0_i32 = arith.constant 0 : i32
    %c0_i32_0 = arith.constant 0 : i32
    %c0_i32_1 = arith.constant 0 : i32
    return %c0_i32, %c0_i32_0 : i32, i32
  }
  func.func @transform_6(%arg0: i32) -> (i32, i32) {
    %c0_i32 = arith.constant 0 : i32
    %c0_i32_0 = arith.constant 0 : i32
    %c0_i32_1 = arith.constant 0 : i32
    return %c0_i32, %c0_i32_0 : i32, i32
  }
  func.func @transform_7(%arg0: i32) -> (i32, i32) {
    %c0_i32 = arith.constant 0 : i32
    %c0_i32_0 = arith.constant 0 : i32
    return %arg0, %c0_i32 : i32, i32
  }
}

</mosaic_0001>

<bundles_post_ra>
// kernel: regression_head_padded.1
= control target key start
LH: loop header
LB: loop body
LE: loop exit
PB: predicated region body
PF: predicated region fallthrough
CT: control target
= control target key end

     0   :  { %12 = vsyncpa [#allocation3], 0  ;;  %s1315_s0 = inlined_call_operand.vmem [shape: f32[16,128], index: 0, kind: input, shape index: {}]   ;;  %s1316_s1 = inlined_call_operand.hbm [shape: f32[128,128], index: 1, kind: input, shape index: {}]   ;;  %s1317_s2 = inlined_call_operand.vmem [shape: f32[1,128], index: 2, kind: input, shape index: {}]   ;;  %s1318_s3 = inlined_call_operand.hbm [shape: f32[128,128], index: 3, kind: input, shape index: {}]   ;;  %s1319_s4 = inlined_call_operand.vmem [shape: f32[1,128], index: 4, kind: input, shape index: {}]   ;;  %s1320_s5 = inlined_call_operand.hbm [shape: f32[128,128], index: 5, kind: input, shape index: {}]   ;;  %s1321_s6 = inlined_call_operand.vmem [shape: f32[1,128], index: 6, kind: input, shape index: {}]   ;;  %s1322_s7 = inlined_call_operand.vmem [shape: f32[16,128], index: 7, kind: output, shape index: {}]  }
   0x1   :  { %13 = vsyncpa [#allocation5], 0  ;;  %s1145_s24 = smov 0  }
   0x2 LB: > { %s1151_s25 = sadd.s32 4294967295, %s1095_s24   ;;  %p699_p0 = scmp.ge.s32.totalorder %s1095_s24, 1  ;;  %s1095_s24 = sphi %s1145_s24, %s19_s24  }
   0x3   : > { %p202_p1 = scmp.lt.s32.totalorder %s1095_s24, 3  ;;  %p1323_p2 = scmp.eq.s32.totalorder %s1151_s25, 0 }
   0x4   : > { %s1097_s27 = smov [#allocation4]   ;;  %s1098_s29 = smov [#allocation2]  }
   0x5   : > { %p1156_p3 = pnand %p699_p0, %p202_p1  ;;  %s230_s28 = sshll.u32 %s1097_s27, 4  ;;  %s231_s28 = int_to_ptr.vmem [resolvable:$true] %s230_s28 }
   0x6   : > { %s214_s30 = sshll.u32 %s1098_s29, 4  ;;  %s1099_s9 = smov [#allocation6]   ;;  %s1168_s30 = int_to_ptr.vmem [resolvable:$true] %s214_s30 }
   0x7   : > { %s1325_s26 = scalar_select %p1156_p3, 1, 0 }
   0x8   : > { %p957_p4 = pneg %p1156_p3  ;;  %s246_s10 = sshll.u32 %s1099_s9, 4  ;;  %s1170_s10 = int_to_ptr.vmem [resolvable:$true] %s246_s10 }
   0x9   : > { %s997_s13 = scalar_lea.hbm %s1318_s3, 2048 }
   0xa   : > { %p1164_p5 = pnand %p1323_p2, %p957_p4  ;;  %p998_p6 = scmp.ne.s32.totalorder %s1318_s3, %s997_s13 }
   0xb   : > { %p1004_p10 = scmp.lt.u32.totalorder %s997_s13, %s1318_s3 }
   0xc   : > { %p1180_p7 = pneg %p1164_p5 }
   0xe   : > { %p1000_p8 = pnand %p1180_p7, %p998_p6 }
  0x10   : > { %p1001_p9 = pneg %p1000_p8 }
  0x12   : > { %p1006_p11 = pnand %p1004_p10, %p1001_p9 }
  0x14   : > { %1009 = shalt.err (!%p1006_p11)
}
  0x15   : > { %s1010_s19 = scalar_lea.vmem %s231_s28, 2048  ;;  %p1018_p1 = scmp.lt.s32.totalorder %s231_s28, %s231_s28 }
  0x16   : > { %p1011_p12 = scmp.ne.s32.totalorder %s231_s28, %s1010_s19  ;;  %p1019_p4 = scmp.lt.s32.totalorder %s1010_s19, %s1010_s19 }
  0x18   : > { %p1013_p13 = pnand %p1011_p12, %p1180_p7  ;;  %p1020_p2 = por %p1019_p4, %p1018_p1 }
  0x1a   : > { %p1014_p0 = pneg %p1013_p13 }
  0x1c   : > { %p1021_p3 = pnand %p1020_p2, %p1014_p0 }
  0x1e   : > { %1024 = shalt.err (!%p1021_p3)
}
  0x1f   : > { %s1100_s20 = smov 128   ;;  %s1101_s21 = smov 8  }
  0x20   : > { %963 = dma.hbm_to_vmem [thread:$0]  (!%p1164_p5), %s1318_s3, 2048, %s231_s28, [#allocation5], %s1100_s20, %s1100_s20, %s1101_s21  }
  0x21   : > { %s1025_s9 = scalar_lea.hbm %s1316_s1, 2048 }
  0x22   : > { %p1026_p2 = scmp.ne.s32.totalorder %s1316_s1, %s1025_s9  ;;  %p1032_p8 = scmp.lt.u32.totalorder %s1025_s9, %s1316_s1 }
  0x24   : > { %p1028_p3 = pnand %p1026_p2, %p1180_p7 }
  0x26   : > { %p1029_p6 = pneg %p1028_p3 }
  0x28   : > { %p1034_p9 = pnand %p1032_p8, %p1029_p6 }
  0x2a   : > { %1037 = shalt.err (!%p1034_p9)
}
  0x2b   : > { %s1038_s28 = scalar_lea.vmem %s1168_s30, 2048  ;;  %p1046_p13 = scmp.lt.s32.totalorder %s1168_s30, %s1168_s30 }
  0x2c   : > { %p1039_p10 = scmp.ne.s32.totalorder %s1168_s30, %s1038_s28  ;;  %p1047_p0 = scmp.lt.s32.totalorder %s1038_s28, %s1038_s28 }
  0x2e   : > { %p1041_p11 = pnand %p1039_p10, %p1180_p7  ;;  %p1048_p1 = por %p1047_p0, %p1046_p13 }
  0x30   : > { %p1042_p12 = pneg %p1041_p11 }
  0x32   : > { %p1049_p4 = pnand %p1048_p1, %p1042_p12 }
  0x34   : > { %1052 = shalt.err (!%p1049_p4)
}
  0x35   : > { %960 = dma.hbm_to_vmem [thread:$0]  (!%p1164_p5), %s1316_s1, 2048, %s1168_s30, [#allocation3], %s1100_s20, %s1100_s20, %s1101_s21  }
  0x36   : > { %s1053_s22 = scalar_lea.hbm %s1320_s5, 2048 }
  0x37   : > { %p1054_p2 = scmp.ne.s32.totalorder %s1320_s5, %s1053_s22  ;;  %p1060_p8 = scmp.lt.u32.totalorder %s1053_s22, %s1320_s5 }
  0x39   : > { %p1056_p3 = pnand %p1054_p2, %p1180_p7 }
  0x3b   : > { %p1057_p6 = pneg %p1056_p3 }
  0x3d   : > { %p1062_p9 = pnand %p1060_p8, %p1057_p6 }
  0x3f   : > { %1065 = shalt.err (!%p1062_p9)
}
  0x40   : > { %s1066_s30 = scalar_lea.vmem %s1170_s10, 2048  ;;  %p1074_p13 = scmp.lt.s32.totalorder %s1170_s10, %s1170_s10 }
  0x41   : > { %p1067_p10 = scmp.ne.s32.totalorder %s1170_s10, %s1066_s30  ;;  %p1075_p0 = scmp.lt.s32.totalorder %s1066_s30, %s1066_s30 }
  0x43   : > { %p1069_p11 = pnand %p1067_p10, %p1180_p7  ;;  %p1076_p1 = por %p1075_p0, %p1074_p13 }
  0x45   : > { %p1070_p12 = pneg %p1069_p11 }
  0x47   : > { %p1077_p4 = pnand %p1076_p1, %p1070_p12 }
  0x49   : > { %1080 = shalt.err (!%p1077_p4)
}
  0x4a   : > { %966 = dma.hbm_to_vmem [thread:$0]  (!%p1164_p5), %s1320_s5, 2048, %s1170_s10, [#allocation5], %s1100_s20, %s1100_s20, %s1101_s21  }
  0x4b   : > { %p1328_p2 = scmp.ne.s32.totalorder %s1325_s26, 0 }
  0x4c   : > { %p1329_p7 = scmp.eq.s32.totalorder (!%p1328_p2), %s1151_s25, 0 }
  0x4d   : > { %272 = sbr.rel (%p1328_p2) target bundleno = 823 (0x337), region = 48 }
  0x54   : > { %1086 = dma.done.wait (%p1329_p7), [#allocation3], 2048   ;;  %p1330_p3 = pmov %p1329_p7 }
  0x56   : > { %1088 = vsyncadd (%p1330_p3), [#allocation3], 4294965248  ;;  %p1331_p6 = pmov %p1330_p3 }
  0x57   : > { %p1332_p8 = pmov %p1330_p3 }
  0x58   : > { %1090 = dma.done.wait (%p1331_p6), [#allocation5], 4096  }
  0x59   : > { %1092 = vsyncadd (%p1332_p8), [#allocation5], 4294963200  ;;  %v1102_v0 = vmov 0.0|0.0   ;;  %vm1103_vm0 = vmmov 0   ;;  %v1104_v1 = vmov 0.0   ;;  %v319_v2 = vld [vmem:[#allocation2] sm:$0xff] }
  0x5a   : > { %873 = vmatprep.subr.bf16.mxu0 %v1102_v0  ;;  %800 = vmatprep.mubr.msk.f32.mxu0 %vm1103_vm0, %v1104_v1  ;;  %v320_v3 = vld [vmem:[#allocation2 + $0x8] sm:$0xff]  ;;  %v321_v4 = vld [vmem:[#allocation2 + $0x10] sm:$0xff]  ;;  %v322_v6 = vld [vmem:[#allocation2 + $0x18] sm:$0xff]  ;;  %p310_p5 = scmp.lt.s32.totalorder %s1151_s25, 1 }
  0x5b   : > { %897 = vmatprep.subr.bf16.mxu1 %v1102_v0  ;;  %835 = vmatprep.mubr.msk.f32.mxu1 %vm1103_vm0, %v1104_v1  ;;  %v874_v5 = vpack.c.bf16 %v320_v3, %v319_v2  ;;  %v877_v7 = vpack.c.bf16 %v322_v6, %v321_v4  ;;  %v323_v8 = vld [vmem:[#allocation2 + $0x20] sm:$0xff]  ;;  %v324_v9 = vld [vmem:[#allocation2 + $0x28] sm:$0xff]  ;;  %v325_v11 = vld [vmem:[#allocation2 + $0x30] sm:$0xff] }
  0x5c   : > { %v880_v10 = vpack.c.bf16 %v324_v9, %v323_v8  ;;  %v326_v12 = vld [vmem:[#allocation2 + $0x38] sm:$0xff]  ;;  %v327_v14 = vld [vmem:[#allocation2 + $0x40] sm:$0xff]  ;;  %v328_v15 = vld [vmem:[#allocation2 + $0x48] sm:$0xff]  ;;  %s1334_s25 = smov (!%p310_p5, %s1151_s25), 1 }
  0x5d   : > { %875 = vmatpush3.bf16.msra.mxu0 %v874_v5  ;;  %v883_v13 = vpack.c.bf16 %v326_v12, %v325_v11  ;;  %v886_v16 = vpack.c.bf16 %v328_v15, %v327_v14  ;;  %v329_v17 = vld [vmem:[#allocation2 + $0x50] sm:$0xff]  ;;  %v330_v18 = vld [vmem:[#allocation2 + $0x58] sm:$0xff]  ;;  %v331_v20 = vld [vmem:[#allocation2 + $0x60] sm:$0xff]  ;;  %s708_s26 = sshll.u32 %s1334_s25, 3 }
  0x5e   : > { %876 = vmatprep.subr.bf16.mxu0 %v1102_v0  ;;  %v889_v19 = vpack.c.bf16 %v330_v18, %v329_v17  ;;  %v332_v21 = vld [vmem:[#allocation2 + $0x68] sm:$0xff]  ;;  %v333_v23 = vld [vmem:[#allocation2 + $0x70] sm:$0xff]  ;;  %v334_v24 = vld [vmem:[#allocation2 + $0x78] sm:$0xff]  ;;  %s313_s16 = scalar_lea.vmem %s1315_s0, %s708_s26  ;;  %s317_s19 = scalar_lea.vmem %s1322_s7, %s708_s26 }
  0x5f   : > { %v892_v22 = vpack.c.bf16 %v332_v21, %v331_v20  ;;  %v895_v25 = vpack.c.bf16 %v334_v24, %v333_v23  ;;  %v318_v26 = vld [vmem:[%s313_s16] sm:$0xff]  ;;  %v420_v28 = vld [vmem:[#allocation4 + $0x8] sm:$0xff]  ;;  %v421_v30 = vld [vmem:[#allocation4 + $0x10] sm:$0xff] }
  0x60   : > { %v419_v27 = vld [vmem:[#allocation4] sm:$0xff]  ;;  %v422_v31 = vld [vmem:[#allocation4 + $0x18] sm:$0xff]  ;;  %v424_v34 = vld [vmem:[#allocation4 + $0x28] sm:$0xff] }
  0x61   : > { %878 = vmatpush3.bf16.msra.mxu0 %v877_v7  ;;  %v898_v29 = vpack.c.bf16 %v420_v28, %v419_v27  ;;  %v901_v32 = vpack.c.bf16 %v422_v31, %v421_v30  ;;  %v423_v33 = vld [vmem:[#allocation4 + $0x20] sm:$0xff]  ;;  %v425_v36 = vld [vmem:[#allocation4 + $0x30] sm:$0xff]  ;;  %v426_v37 = vld [vmem:[#allocation4 + $0x38] sm:$0xff] }
  0x62   : > { %879 = vmatprep.subr.bf16.mxu0 %v1102_v0  ;;  %v904_v35 = vpack.c.bf16 %v424_v34, %v423_v33  ;;  %v907_v38 = vpack.c.bf16 %v426_v37, %v425_v36  ;;  %v427_v39 = vld [vmem:[#allocation4 + $0x40] sm:$0xff]  ;;  %v428_v40 = vld [vmem:[#allocation4 + $0x48] sm:$0xff]  ;;  %v429_v42 = vld [vmem:[#allocation4 + $0x50] sm:$0xff] }
  0x63   : > { %899 = vmatpush3.bf16.msra.mxu1 %v898_v29  ;;  %v910_v41 = vpack.c.bf16 %v428_v40, %v427_v39  ;;  %v430_v43 = vld [vmem:[#allocation4 + $0x58] sm:$0xff]  ;;  %v431_v45 = vld [vmem:[#allocation4 + $0x60] sm:$0xff]  ;;  %v432_v46 = vld [vmem:[#allocation4 + $0x68] sm:$0xff] }
  0x64   : > { %900 = vmatprep.subr.bf16.mxu1 %v1102_v0  ;;  %v913_v44 = vpack.c.bf16 %v430_v43, %v429_v42  ;;  %v916_v47 = vpack.c.bf16 %v432_v46, %v431_v45  ;;  %v433_v48 = vld [vmem:[#allocation4 + $0x70] sm:$0xff]  ;;  %v434_v49 = vld [vmem:[#allocation4 + $0x78] sm:$0xff]  ;;  %v710_v51 = vld [vmem:[%s1317_s2] ss:$0 sm:$0xff] }
  0x65   : > { %881 = vmatpush3.bf16.msra.mxu0 %v880_v10  ;;  %v919_v50 = vpack.c.bf16 %v434_v49, %v433_v48  ;;  %v519_v60 = vld [vmem:[#allocation6] sm:$0xff]  ;;  %v520_v61 = vld [vmem:[#allocation6 + $0x8] sm:$0xff]  ;;  %v521_v63 = vld [vmem:[#allocation6 + $0x10] sm:$0xff] }
  0x66   : > { %882 = vmatprep.subr.bf16.mxu0 %v1102_v0  ;;  %v922_v62 = vpack.c.bf16 %v520_v61, %v519_v60  ;;  %v523_v3 = vld [vmem:[#allocation6 + $0x20] sm:$0xff]  ;;  %v524_v4 = vld [vmem:[#allocation6 + $0x28] sm:$0xff]  ;;  %v525_v6 = vld [vmem:[#allocation6 + $0x30] sm:$0xff] }
  0x67   : > { %902 = vmatpush3.bf16.msra.mxu1 %v901_v32  ;;  %v928_v5 = vpack.c.bf16 %v524_v4, %v523_v3  ;;  %v526_v7 = vld [vmem:[#allocation6 + $0x38] sm:$0xff]  ;;  %v527_v9 = vld [vmem:[#allocation6 + $0x40] sm:$0xff]  ;;  %v528_v10 = vld [vmem:[#allocation6 + $0x48] sm:$0xff] }
  0x68   : > { %903 = vmatprep.subr.bf16.mxu1 %v1102_v0  ;;  %v931_v8 = vpack.c.bf16 %v526_v7, %v525_v6  ;;  %v934_v11 = vpack.c.bf16 %v528_v10, %v527_v9  ;;  %v529_v12 = vld [vmem:[#allocation6 + $0x50] sm:$0xff]  ;;  %v531_v15 = vld [vmem:[#allocation6 + $0x60] sm:$0xff] }
  0x69   : > { %884 = vmatpush3.bf16.msra.mxu0 %v883_v13  ;;  %v530_v13 = vld [vmem:[#allocation6 + $0x58] sm:$0xff]  ;;  %v533_v18 = vld [vmem:[#allocation6 + $0x70] sm:$0xff]  ;;  %v712_v21 = vld [vmem:[%s1319_s4] ss:$0 sm:$0xff] }
  0x6a   : > { %885 = vmatprep.subr.bf16.mxu0 %v1102_v0  ;;  %v937_v14 = vpack.c.bf16 %v530_v13, %v529_v12 }
  0x6b   : > { %905 = vmatpush3.bf16.msra.mxu1 %v904_v35 }
  0x6c   : > { %906 = vmatprep.subr.bf16.mxu1 %v1102_v0 }
  0x6d   : > { %887 = vmatpush3.bf16.msra.mxu0 %v886_v16  ;;  %v532_v16 = vld [vmem:[#allocation6 + $0x68] sm:$0xff] }
  0x6e   : > { %888 = vmatprep.subr.bf16.mxu0 %v1102_v0  ;;  %v940_v17 = vpack.c.bf16 %v532_v16, %v531_v15 }
  0x6f   : > { %908 = vmatpush3.bf16.msra.mxu1 %v907_v38 }
  0x70   : > { %909 = vmatprep.subr.bf16.mxu1 %v1102_v0 }
  0x71   : > { %890 = vmatpush3.bf16.msra.mxu0 %v889_v19  ;;  %v534_v19 = vld [vmem:[#allocation6 + $0x78] sm:$0xff] }
  0x72   : > { %891 = vmatprep.subr.bf16.mxu0 %v1102_v0  ;;  %v943_v20 = vpack.c.bf16 %v534_v19, %v533_v18 }
  0x73   : > { %911 = vmatpush3.bf16.msra.mxu1 %v910_v41 }
  0x74   : > { %912 = vmatprep.subr.bf16.mxu1 %v1102_v0 }
  0x75   : > { %893 = vmatpush3.bf16.msra.mxu0 %v892_v22 }
  0x76   : > { %894 = vmatprep.subr.bf16.mxu0 %v1102_v0 }
  0x77   : > { %914 = vmatpush3.bf16.msra.mxu1 %v913_v44 }
  0x78   : > { %915 = vmatprep.subr.bf16.mxu1 %v1102_v0 }
  0x79   : > { %896 = vmatpush3.bf16.msra.mxu0 %v895_v25 }
  0x7a   : > { %921 = vmatprep.subr.bf16.mxu0 %v1102_v0 }
  0x7b   : > { %917 = vmatpush3.bf16.msra.mxu1 %v916_v47 }
  0x7c   : > { %801 = vmatmul.mubr.f32.vlgmr.msra.gmra.mrb[0].mxu0 %v318_v26  ;;  %918 = vmatprep.subr.bf16.mxu1 %v1102_v0 }
  0x7d   : > { %870 = vmatprep.mubr.msk.f32.mxu0 %vm1103_vm0, %v1104_v1  ;;  %923 = vmatpush3.bf16.msra.mxu0 %v922_v62  ;;  %v522_v1 = vld [vmem:[#allocation6 + $0x18] sm:$0xff] }
  0x7e   : > { %924 = vmatprep.subr.bf16.mxu0 %v1102_v0  ;;  %v925_v2 = vpack.c.bf16 %v522_v1, %v521_v63 }
  0x7f   : > { %920 = vmatpush3.bf16.msra.mxu1 %v919_v50 }
  0x81   : > { %926 = vmatpush3.bf16.msra.mxu0 %v925_v2 }
  0x82   : > { %927 = vmatprep.subr.bf16.mxu0 %v1102_v0 }
  0x85   : > { %929 = vmatpush3.bf16.msra.mxu0 %v928_v5 }
  0x86   : > { %930 = vmatprep.subr.bf16.mxu0 %v1102_v0 }
  0x89   : > { %932 = vmatpush3.bf16.msra.mxu0 %v931_v8 }
  0x8a   : > { %933 = vmatprep.subr.bf16.mxu0 %v1102_v0 }
  0x8d   : > { %935 = vmatpush3.bf16.msra.mxu0 %v934_v11 }
  0x8e   : > { %936 = vmatprep.subr.bf16.mxu0 %v1102_v0 }
  0x91   : > { %938 = vmatpush3.bf16.msra.mxu0 %v937_v14 }
  0x92   : > { %939 = vmatprep.subr.bf16.mxu0 %v1102_v0 }
  0x95   : > { %941 = vmatpush3.bf16.msra.mxu0 %v940_v17 }
  0x96   : > { %942 = vmatprep.subr.bf16.mxu0 %v1102_v0  ;;  %v714_v0 = vld [vmem:[%s1321_s6] ss:$0 sm:$0xff] }
  0x99   : > { %944 = vmatpush3.bf16.msra.mxu0 %v943_v20 }
 0x14f   : > { %v408_v52 = vpop.f32.mrb[0].mxu0 }
 0x150   : > { %v409_v53 = vadd.f32 %v710_v51, %v408_v52  ;;  %v802_v54 = vpop.f32.mrb[1].mxu0 }
 0x152   : > { %v711_v55 = vmul.f32 -1.442695, %v409_v53 }
 0x154   : > { %989 = vpow2.f32 %v711_v55 }
 0x15e   : > { %v990_v56 = vpop.eup %989 }
 0x15f   : > { %v415_v57 = vadd.f32 1.0, %v990_v56 }
 0x161   : > { %991 = vrcp.f32 %v415_v57 }
 0x16b   : > { %v992_v58 = vpop.eup %991 }
 0x16c   : > { %v418_v59 = vmul.f32 %v992_v58, %v409_v53 }
 0x16e   : > { %836 = vmatmul.mubr.f32.vlgmr.msra.gmra.mrb[0].mxu1 %v418_v59 }
 0x241   : > { %v508_v22 = vpop.f32.mrb[0].mxu1 }
 0x242   : > { %v509_v23 = vadd.f32 %v712_v21, %v508_v22  ;;  %v837_v24 = vpop.f32.mrb[1].mxu1 }
 0x244   : > { %v713_v25 = vmul.f32 -1.442695, %v509_v23 }
 0x246   : > { %993 = vpow2.f32 %v713_v25 }
 0x250   : > { %v994_v26 = vpop.eup %993 }
 0x251   : > { %v515_v27 = vadd.f32 1.0, %v994_v26 }
 0x253   : > { %995 = vrcp.f32 %v515_v27 }
 0x25d   : > { %v996_v28 = vpop.eup %995 }
 0x25e   : > { %v518_v29 = vmul.f32 %v996_v28, %v509_v23 }
 0x260   : > { %871 = vmatmul.mubr.f32.vlgmr.msra.gmra.mrb[2].mxu0 %v518_v29 }
 0x333   : > { %v608_v30 = vpop.f32.mrb[2].mxu0 }
 0x334   : > { %v609_v31 = vadd.f32 %v714_v0, %v608_v30  ;;  %v872_v32 = vpop.f32.mrb[3].mxu0 }
 0x336   : > { %612 = vst [vmem:[%s317_s19] sm:$0xff] %v609_v31 }
 0x337 PF: > { %s19_s24 = sadd.s32 1, %s1095_s24  }
 0x338   : > { %p16_p9 = scmp.ge.s32.totalorder %s19_s24, 4  }
 0x33a   :  { %18 = sbr.rel (!%p16_p9) target bundleno = 2 (0x2), region = 91 }
 0x341   :  { %632 = vsyncpa [#allocation3], 1 }
 0x342   :  { %634 = vsyncpa [#allocation3 + $0x1], 1 }
 0x343   :  { %635 = vsyncpa [#allocation5], 1 }

</bundles_post_ra>
